<compile_context>
chip_gen: v7x
topology: tpu7x:2x2x1
jax: 0.10.0
libtpu: 0.0.40
codegen_flags: <defaults>
</compile_context>

<pallas_src>
import jax
import jax.numpy as jnp
from jax.experimental import pallas as pl
from jax.experimental.pallas import tpu as pltpu


def _round_up(x: int, m: int) -> int:
    return ((x + m - 1) // m) * m


def _cdiv(a: int, b: int) -> int:
    return (a + b - 1) // b


def _sublane(dtype) -> int:
    # Minimum sublane tile: f32 -> 8, bf16/f16 -> 16, int8/fp8 -> 32.
    return max(8, 32 // jnp.dtype(dtype).itemsize)


def _choose_tile(dim: int, max_tile: int, align: int):
    """Balanced tile <= ~max_tile that is `align`-aligned and divides the
    padded dim (keeps padding waste to at most one alignment group)."""
    dim_a = _round_up(max(dim, 1), align)
    n_tiles = max(1, _cdiv(dim_a, max_tile))
    tile = _round_up(_cdiv(dim_a, n_tiles), align)
    return tile, _round_up(dim, tile)


# ---------------------------------------------------------------------------
# Kernels
# ---------------------------------------------------------------------------

def _expert_linear_kernel_accum_out(x_ref, w_ref, b_ref, o_ref):
    """f32 output: accumulate directly into the resident output block
    (its block index ignores k, so it stays in VMEM across the K axis)."""
    k = pl.program_id(3)

    @pl.when(k == 0)
    def _init():
        # Bias folded into the accumulator init (added exactly once).
        o_ref[0] = jnp.broadcast_to(b_ref[0].astype(o_ref.dtype), o_ref.shape[1:])

    # Plain [tm, tk] @ [tk, tn] MXU matmul; f32 accumulation.
    o_ref[0] += jnp.dot(x_ref[0], w_ref[0], preferred_element_type=jnp.float32)


def _expert_linear_kernel_scratch(x_ref, w_ref, b_ref, o_ref, acc_ref):
    """Non-f32 (e.g. bf16) output: f32 VMEM accumulator + finalize cast."""
    k = pl.program_id(3)

    @pl.when(k == 0)
    def _init():
        acc_ref[...] = jnp.broadcast_to(b_ref[0].astype(jnp.float32), acc_ref.shape)

    acc_ref[...] += jnp.dot(x_ref[0], w_ref[0], preferred_element_type=jnp.float32)

    @pl.when(k == pl.num_programs(3) - 1)
    def _finalize():
        o_ref[0] = acc_ref[...].astype(o_ref.dtype)


# ---------------------------------------------------------------------------
# Wrapper
# ---------------------------------------------------------------------------

def prepare_expert_linear_weight(weight):
    """One-time (param-load-time) transpose: (E, D_out, D_in) -> (E, D_in, D_out).

    Do this once when loading parameters so the forward pass never pays an
    extra full HBM read+write for the transpose."""
    return jnp.swapaxes(weight, 1, 2)


def expert_linear(x, weight, bias=None, *, weight_transposed=False,
                  compute_dtype=None, tm=512, tn=512, tk=1024):
    """Per-expert linear layer.

    x:      (E, N, D_in)
    weight: (E, D_out, D_in), or (E, D_in, D_out) if weight_transposed=True
    bias:   (E, D_out) or None
    compute_dtype: optional operand dtype (e.g. jnp.bfloat16) for the MXU fast
      path; accumulation is always f32 and the output keeps x.dtype.
    returns (E, N, D_out), dtype of x.
    """
    E, N, D_in = x.shape
    if weight_transposed:
        D_out = weight.shape[2]
        wt = weight
    else:
        D_out = weight.shape[1]
        # Prefer prepare_expert_linear_weight() at param-load time instead.
        wt = jnp.swapaxes(weight, 1, 2)

    out_dtype = jnp.dtype(x.dtype)
    cdt = jnp.dtype(compute_dtype) if compute_dtype is not None else out_dtype
    if bias is None:
        bias = jnp.zeros((E, D_out), dtype=jnp.float32)

    xc = x.astype(cdt)
    wc = wt.astype(cdt)

    # Dtype-aware, pad-waste-aware tile selection.
    sub = _sublane(cdt)
    tm, Np = _choose_tile(N, tm, sub)
    tn, Op = _choose_tile(D_out, tn, 128)
    tk, Kp = _choose_tile(D_in, tk, 128)

    # Ensure >= 2 parallel grid units for dual-TensorCore chips (v7x) when the
    # problem allows it (E==1 with a single output tile would idle one TC).
    if E * (Op // tn) * (Np // tm) < 2:
        if Op // 128 >= 2:
            tn = _round_up(_cdiv(Op, 2), 128)
            Op = _round_up(D_out, tn)
        elif Np // sub >= 2:
            tm = _round_up(_cdiv(Np, 2), sub)
            Np = _round_up(N, tm)

    # Zero-padding along K is load-bearing: padded K columns must contribute 0.
    xp = xc if (Np, Kp) == (N, D_in) else jnp.pad(
        xc, ((0, 0), (0, Np - N), (0, Kp - D_in)))
    wp = wc if (Kp, Op) == (D_in, D_out) else jnp.pad(
        wc, ((0, 0), (0, Kp - D_in), (0, Op - D_out)))
    bp = bias if Op == D_out else jnp.pad(bias, ((0, 0), (0, Op - D_out)))
    bp = bp.reshape(E, 1, Op)

    grid = (E, Op // tn, Np // tm, Kp // tk)  # (expert, out-tile, row-tile, k)

    use_scratch = out_dtype != jnp.dtype(jnp.float32)
    kernel = _expert_linear_kernel_scratch if use_scratch \
        else _expert_linear_kernel_accum_out
    scratch = [pltpu.VMEM((tm, tn), jnp.float32)] if use_scratch else []

    # Advisory cost estimate: per-operand itemsize, padded sizes, re-read factors.
    csize = cdt.itemsize
    bsize = jnp.dtype(bias.dtype).itemsize
    osize = out_dtype.itemsize
    cost = pl.CostEstimate(
        flops=2 * E * Np * Kp * Op,
        transcendentals=0,
        bytes_accessed=(xp.size * csize * (Op // tn)
                        + wp.size * csize * (Np // tm)
                        + bp.size * bsize * (Np // tm)
                        + E * Np * Op * osize),
    )

    # Resident VMEM: double-buffered x/w/bias + output block (+ f32 scratch).
    resident = (2 * (tm * tk + tk * tn) * csize + 2 * tn * bsize
                + 2 * tm * tn * osize + (tm * tn * 4 if use_scratch else 0))
    cp_kwargs = dict(
        dimension_semantics=("parallel", "parallel", "parallel", "arbitrary"))
    if resident > 16 * 1024 * 1024:  # v5e scoped-VMEM default is 16 MiB
        cp_kwargs["vmem_limit_bytes"] = min(resident * 3 // 2, 64 * 1024 * 1024)

    out = pl.pallas_call(
        kernel,
        out_shape=jax.ShapeDtypeStruct((E, Np, Op), out_dtype),
        grid_spec=pltpu.PrefetchScalarGridSpec(
            num_scalar_prefetch=0,
            grid=grid,
            in_specs=[
                # x tile: depends on (expert, row-tile, k)
                pl.BlockSpec((1, tm, tk), lambda e, j, i, k: (e, i, k)),
                # weight tile: invariant across the row-tile (N) axis
                pl.BlockSpec((1, tk, tn), lambda e, j, i, k: (e, k, j)),
                # bias tile: invariant across row-tile and k
                pl.BlockSpec((1, 1, tn), lambda e, j, i, k: (e, 0, j)),
            ],
            out_specs=pl.BlockSpec((1, tm, tn), lambda e, j, i, k: (e, i, j)),
            scratch_shapes=scratch,
        ),
        compiler_params=pltpu.CompilerParams(**cp_kwargs),
        cost_estimate=cost,
    )(xp, wp, bp)

    return out[:, :N, :D_out]


def init_params(key, num_experts, in_features, out_features):
    # Mirrors reset_parameters(): trunc_normal_(weight, std=0.02), zeros_(bias)
    w = 0.02 * jax.random.truncated_normal(
        key, -2.0, 2.0, (num_experts, out_features, in_features),
        dtype=jnp.float32,
    )
    b = jnp.zeros((num_experts, out_features), dtype=jnp.float32)
    return w, b


if __name__ == "__main__":
    num_experts = 4
    in_features = 32
    out_features = 16
    tokens_per_expert = 8

    key = jax.random.PRNGKey(0)
    k_x, k_p = jax.random.split(key)

    x = jax.random.normal(
        k_x, (num_experts, tokens_per_expert, in_features), dtype=jnp.float32
    )
    weight, bias = init_params(k_p, num_experts, in_features, out_features)

    # One-time transpose at "parameter load time" (hoisted out of the forward).
    wt = prepare_expert_linear_weight(weight)

    # Reference (same math as the PyTorch forward).
    ref = jnp.einsum("enk,eok->eno", x, weight) + bias[:, None, :]

    # 1) f32 path: no scratch, direct accumulation into the output block.
    out_f32 = jax.block_until_ready(
        expert_linear(x, wt, bias, weight_transposed=True))
    assert out_f32.shape == (num_experts, tokens_per_expert, out_features)
    assert jnp.allclose(out_f32, ref, atol=1e-5, rtol=1e-5)

    # 2) bf16 operand path (f32 accumulation, f32 output).
    out_bf16_ops = jax.block_until_ready(
        expert_linear(x, wt, bias, weight_transposed=True,
                      compute_dtype=jnp.bfloat16))
    assert jnp.allclose(out_bf16_ops, ref, atol=3e-2, rtol=3e-2)

    # 3) bf16 output path (exercises the f32-scratch + finalize kernel).
    out_bf16 = jax.block_until_ready(
        expert_linear(x.astype(jnp.bfloat16), wt, bias, weight_transposed=True))
    assert out_bf16.dtype == jnp.bfloat16
    assert jnp.allclose(out_bf16.astype(jnp.float32), ref, atol=3e-2, rtol=3e-2)

    print("KERNEL_OK")
</pallas_src>

<mosaic_0001>
module attributes {stable_mosaic.version = 11 : i64} {
  func.func @_expert_linear_kernel_accum_out(%arg0: i32, %arg1: i32, %arg2: i32, %arg3: i32, %arg4: memref<1x8x128xf32, #tpu.memory_space<vmem>>, %arg5: memref<1x128x128xf32, #tpu.memory_space<vmem>>, %arg6: memref<1x1x128xf32, #tpu.memory_space<vmem>>, %arg7: memref<1x8x128xf32, #tpu.memory_space<vmem>>) attributes {dimension_semantics = [#tpu.dimension_semantics<parallel>, #tpu.dimension_semantics<parallel>, #tpu.dimension_semantics<parallel>, #tpu.dimension_semantics<arbitrary>], iteration_bounds = array<i64: 4, 1, 1, 1>, scalar_prefetch = 0 : i64, scratch_operands = 0 : i64, tpu.core_type = #tpu.core_type<tc>, window_params = [{transform_indices = @transform_0, window_bounds = array<i64: 1, 8, 128>}, {transform_indices = @transform_1, window_bounds = array<i64: 1, 128, 128>}, {transform_indices = @transform_2, window_bounds = array<i64: 1, 1, 128>}, {transform_indices = @transform_3, window_bounds = array<i64: 1, 8, 128>}]} {
    %c0_i32 = arith.constant 0 : i32
    %0 = arith.cmpi eq, %arg3, %c0_i32 : i32
    %1 = arith.extui %0 : i1 to i32
    %c0_i32_0 = arith.constant 0 : i32
    %2 = arith.cmpi ne, %1, %c0_i32_0 : i32
    scf.if %2 {
      %c0_12 = arith.constant 0 : index
      %c0_13 = arith.constant 0 : index
      %c0_14 = arith.constant 0 : index
      %14 = vector.load %arg6[%c0_12, %c0_13, %c0_14] : memref<1x1x128xf32, #tpu.memory_space<vmem>>, vector<1x1x128xf32>
      %15 = vector.shape_cast %14 : vector<1x1x128xf32> to vector<1x128xf32>
      %16 = vector.shape_cast %15 : vector<1x128xf32> to vector<1x128xf32>
      %17 = vector.broadcast %16 : vector<1x128xf32> to vector<8x128xf32>
      %c0_15 = arith.constant 0 : index
      %c0_16 = arith.constant 0 : index
      %c0_17 = arith.constant 0 : index
      %18 = vector.load %arg7[%c0_15, %c0_16, %c0_17] : memref<1x8x128xf32, #tpu.memory_space<vmem>>, vector<1x8x128xf32>
      %19 = vector.shape_cast %18 : vector<1x8x128xf32> to vector<8x128xf32>
      %20 = vector.shape_cast %17 : vector<8x128xf32> to vector<1x8x128xf32>
      tpu.vector_store %arg7[%c0_15, %c0_16, %c0_17], %20 {strides = array<i32>} : memref<1x8x128xf32, #tpu.memory_space<vmem>>, vector<1x8x128xf32>,
    } else {
    }
    %c0 = arith.constant 0 : index
    %c0_1 = arith.constant 0 : index
    %c0_2 = arith.constant 0 : index
    %3 = vector.load %arg7[%c0, %c0_1, %c0_2] : memref<1x8x128xf32, #tpu.memory_space<vmem>>, vector<1x8x128xf32>
    %4 = vector.shape_cast %3 : vector<1x8x128xf32> to vector<8x128xf32>
    %c0_3 = arith.constant 0 : index
    %c0_4 = arith.constant 0 : index
    %c0_5 = arith.constant 0 : index
    %5 = vector.load %arg4[%c0_3, %c0_4, %c0_5] : memref<1x8x128xf32, #tpu.memory_space<vmem>>, vector<1x8x128xf32>
    %6 = vector.shape_cast %5 : vector<1x8x128xf32> to vector<8x128xf32>
    %c0_6 = arith.constant 0 : index
    %c0_7 = arith.constant 0 : index
    %c0_8 = arith.constant 0 : index
    %7 = vector.load %arg5[%c0_6, %c0_7, %c0_8] : memref<1x128x128xf32, #tpu.memory_space<vmem>>, vector<1x128x128xf32>
    %8 = vector.shape_cast %7 : vector<1x128x128xf32> to vector<128x128xf32>
    %cst = arith.constant dense<0.000000e+00> : vector<8x128xf32>
    %9 = tpu.matmul %6, %8, %cst {dimension_numbers = #tpu.dot_dimension_numbers<[1], [0], [0], [1], [0, 0, 1, 1], [], []>} : vector<8x128xf32>, vector<128x128xf32>, vector<8x128xf32> -> vector<8x128xf32>
    %10 = arith.addf %4, %9 : vector<8x128xf32>
    %c0_9 = arith.constant 0 : index
    %c0_10 = arith.constant 0 : index
    %c0_11 = arith.constant 0 : index
    %11 = vector.load %arg7[%c0_9, %c0_10, %c0_11] : memref<1x8x128xf32, #tpu.memory_space<vmem>>, vector<1x8x128xf32>
    %12 = vector.shape_cast %11 : vector<1x8x128xf32> to vector<8x128xf32>
    %13 = vector.shape_cast %10 : vector<8x128xf32> to vector<1x8x128xf32>
    tpu.vector_store %arg7[%c0_9, %c0_10, %c0_11], %13 {strides = array<i32>} : memref<1x8x128xf32, #tpu.memory_space<vmem>>, vector<1x8x128xf32>,
    return
  }
  func.func @transform_0(%arg0: i32, %arg1: i32, %arg2: i32, %arg3: i32) -> (i32, i32, i32) {
    %c0_i32 = arith.constant 0 : i32
    return %arg0, %arg2, %arg3 : i32, i32, i32
  }
  func.func @transform_1(%arg0: i32, %arg1: i32, %arg2: i32, %arg3: i32) -> (i32, i32, i32) {
    %c0_i32 = arith.constant 0 : i32
    return %arg0, %arg3, %arg1 : i32, i32, i32
  }
  func.func @transform_2(%arg0: i32, %arg1: i32, %arg2: i32, %arg3: i32) -> (i32, i32, i32) {
    %c0_i32 = arith.constant 0 : i32
    %c0_i32_0 = arith.constant 0 : i32
    return %arg0, %c0_i32, %arg1 : i32, i32, i32
  }
  func.func @transform_3(%arg0: i32, %arg1: i32, %arg2: i32, %arg3: i32) -> (i32, i32, i32) {
    %c0_i32 = arith.constant 0 : i32
    return %arg0, %arg2, %arg1 : i32, i32, i32
  }
}

</mosaic_0001>

<bundles_post_ra>
// kernel: tpu_custom_call.1
= control target key start
LH: loop header
LB: loop body
LE: loop exit
PB: predicated region body
PF: predicated region fallthrough
CT: control target
= control target key end

     0   :  { %8 = vsyncpa [#allocation3], 0  ;;  %s1134_s0 = inlined_call_operand.hbm [shape: f32[4,8,128], index: 0, kind: input, shape index: {}]   ;;  %s1135_s1 = inlined_call_operand.hbm [shape: f32[4,128,128], index: 1, kind: input, shape index: {}]   ;;  %s1136_s2 = inlined_call_operand.vmem [shape: f32[4,1,128], index: 2, kind: input, shape index: {}]   ;;  %s1137_s3 = inlined_call_operand.hbm [shape: f32[4,8,128], index: 3, kind: output, shape index: {}]  }
   0x1   :  { %10 = vsyncpa [#allocation3 + $0x1], 0 }
   0x2   :  { %11 = vsyncpa [#allocation6], 0 }
   0x3   :  { %13 = vsyncpa [#allocation6 + $0x1], 0 }
   0x4   :  { %14 = vsyncpa [#allocation4], 0 }
   0x5   :  { %16 = vsyncpa [#allocation4 + $0x1], 0  ;;  %s883_s12 = smov 0   ;;  %s885_s13 = smov 0  }
   0x6   :  { %s887_s14 = smov 0   ;;  %s889_s15 = smov 0  }
   0x7   :  { %s891_s16 = smov 0   ;;  %s893_s17 = smov 0  }
   0x8 LB: > { %s540_s18 = sadd.s32 4294967295, %s853_s17   ;;  %s541_s19 = sadd.s32 4294967294, %s853_s17   ;;  %s853_s17 = sphi %s893_s17, %s22_s17   ;;  %s849_s16 = sphi %s891_s16, %s1155_s16   ;;  %s845_s15 = sphi %s889_s15, %s1154_s15   ;;  %s841_s14 = sphi %s887_s14, %s1153_s14   ;;  %s837_s13 = sphi %s885_s13, %s1152_s13   ;;  %s833_s12 = sphi %s883_s12, %s1151_s12  }
   0x9   : > { %s48_s20 = sadd.s32 1, %s849_s16  ;;  %s59_s21 = sadd.s32 1, %s841_s14 }
   0xa   : > { %p50_p0 = scmp.ge.s32.totalorder %s48_s20, 4  ;;  %p66_p1 = scmp.ne.s32.totalorder %s841_s14, %s837_s13 }
   0xb   : > { %p67_p2 = scmp.eq.s32.totalorder %s853_s17, 0  ;;  %p72_p3 = scmp.ne.s32.totalorder %s837_s13, %s833_s12 }
   0xc   : > { %s1157_s20 = smov (%p50_p0, %s48_s20), 0  ;;  %p73_p5 = scmp.eq.s32.totalorder %s540_s18, 0 }
   0xd   : > { %p924_p4 = por %p67_p2, %p66_p1  ;;  %s52_s23 = ssub.s32 %s849_s16, %s1157_s20 }
   0xe   : > { %p158_p6 = scmp.eq.s32.totalorder %s540_s18, 3  ;;  %p57_p7 = scmp.eq.s32.totalorder %s52_s23, 0 }
   0xf   : > { %p930_p8 = por %p73_p5, %p72_p3  ;;  %p164_p10 = scmp.eq.s32.totalorder %s541_s19, 3 }
  0x10   : > { %p934_p9 = por %p158_p6, %p66_p1  ;;  %p652_p12 = scmp.lt.s32.totalorder %s853_s17, 4 }
  0x11   : > { %s1141_s24 = scalar_select %p930_p8, 1, 0 }
  0x12   : > { %s1142_s25 = scalar_select %p934_p9, 1, 0 }
  0x13   : > { %s939_s26 = scalar_select %p57_p7, %s841_s14, %s59_s21  }
  0x14   : > { %p941_p11 = por %p164_p10, %p72_p3  ;;  %s947_s28 = sand.u32 1, %s841_s14  }
  0x15   : > { %s544_s29 = sshll.u32 %s947_s28, 3  ;;  %s545_s30 = sshll.u32 %s849_s16, 7 }
  0x16   : > { %s1143_s27 = scalar_select %p941_p11, 1, 0 }
  0x17   : > { %s954_s6 = scalar_lea.hbm %s1134_s0, %s545_s30  ;;  %s188_s7 = scalar_lea.vmem [#allocation2], %s544_s29 }
  0x18   : > { %s197_s8 = sshll.u32 %s188_s7, 4  ;;  %p960_p13 = pnand %p652_p12, %p924_p4  ;;  %s956_s8 = int_to_ptr.vmem [resolvable:$true] %s197_s8 }
  0x19   : > { %s185_s10 = scalar_lea.sflag [#allocation3], %s947_s28  ;;  %s707_s11 = scalar_lea.hbm %s954_s6, 128 }
  0x1a   : > { %p708_p2 = scmp.ne.s32.totalorder %s954_s6, %s707_s11  ;;  %p709_p3 = pneg %p960_p13 }
  0x1b   : > { %s712_s21 = scalar_lea.hbm %s1134_s0, 512  ;;  %p713_p4 = scmp.lt.u32.totalorder %s954_s6, %s1134_s0 }
  0x1c   : > { %p710_p5 = pnand %p709_p3, %p708_p2  ;;  %p714_p7 = scmp.lt.u32.totalorder %s712_s21, %s707_s11 }
  0x1d   : > { %p716_p12 = scmp.lt.u32.totalorder %s707_s11, %s954_s6 }
  0x1e   : > { %p711_p6 = pneg %p710_p5  ;;  %p715_p10 = por %p714_p7, %p713_p4 }
  0x20   : > { %p717_p0 = por %p716_p12, %p715_p10 }
  0x22   : > { %p718_p1 = pnand %p717_p0, %p711_p6 }
  0x24   : > { %721 = shalt.err (!%p718_p1)
}
  0x25   : > { %s722_s29 = scalar_lea.vmem %s956_s8, 128  ;;  %s855_s30 = smov [#allocation2]  }
  0x26   : > { %p723_p2 = scmp.ne.s32.totalorder %s956_s8, %s722_s29  ;;  %s727_s4 = sshll.u32 %s855_s30, 4  ;;  %s728_s4 = int_to_ptr.vmem [resolvable:$false] %s727_s4 }
  0x27   : > { %s729_s5 = scalar_lea.vmem %s728_s4, 256  ;;  %p730_p9 = scmp.lt.s32.totalorder %s956_s8, %s728_s4 }
  0x28   : > { %p725_p5 = pnand %p723_p2, %p709_p3  ;;  %p731_p4 = scmp.lt.s32.totalorder %s729_s5, %s722_s29 }
  0x2a   : > { %p726_p11 = pneg %p725_p5  ;;  %p732_p7 = por %p731_p4, %p730_p9 }
  0x2c   : > { %p733_p10 = pnand %p732_p7, %p726_p11 }
  0x2e   : > { %736 = shalt.err (!%p733_p10)
}
  0x2f   : > { %644 = dma.hbm_to_vmem [thread:$0]  (!%p960_p13), %s954_s6, 128, %s956_s8, %s185_s10  }
  0x30   : > { %p1145_p0 = scmp.lt.s32.totalorder %s853_s17, 5  ;;  %p1146_p1 = scmp.ge.s32.totalorder %s853_s17, 1 }
  0x31   : > { %s546_s11 = sshll.u32 %s947_s28, 7  ;;  %s558_s18 = sshll.u32 %s849_s16, 11 }
  0x32   : > { %p996_p6 = pnand %p1146_p1, %p1145_p0  ;;  %s1005_s22 = scalar_lea.hbm %s1135_s1, %s558_s18 }
  0x33   : > { %s208_s23 = scalar_lea.vmem [#allocation5], %s546_s11  ;;  %s205_s6 = scalar_lea.sflag [#allocation6], %s947_s28 }
  0x34   : > { %s218_s29 = sshll.u32 %s208_s23, 4  ;;  %s737_s8 = scalar_lea.hbm %s1005_s22, 2048  ;;  %s1007_s29 = int_to_ptr.vmem [resolvable:$true] %s218_s29 }
  0x35   : > { %p738_p9 = scmp.ne.s32.totalorder %s1005_s22, %s737_s8  ;;  %s742_s4 = scalar_lea.hbm %s1135_s1, 8192 }
  0x36   : > { %p743_p2 = scmp.lt.u32.totalorder %s1005_s22, %s1135_s1  ;;  %p744_p5 = scmp.lt.u32.totalorder %s742_s4, %s737_s8 }
  0x37   : > { %p740_p11 = pnand %p738_p9, %p709_p3  ;;  %p746_p7 = scmp.lt.u32.totalorder %s737_s8, %s1005_s22 }
  0x38   : > { %p745_p4 = por %p744_p5, %p743_p2 }
  0x39   : > { %p741_p12 = pneg %p740_p11 }
  0x3a   : > { %p747_p10 = por %p746_p7, %p745_p4 }
  0x3c   : > { %p748_p0 = pnand %p747_p10, %p741_p12 }
  0x3e   : > { %751 = shalt.err (!%p748_p0)
}
  0x3f   : > { %s752_s11 = scalar_lea.vmem %s1007_s29, 2048  ;;  %s856_s19 = smov [#allocation5]  }
  0x40   : > { %p753_p1 = scmp.ne.s32.totalorder %s1007_s29, %s752_s11  ;;  %s757_s21 = sshll.u32 %s856_s19, 4  ;;  %s758_s21 = int_to_ptr.vmem [resolvable:$false] %s757_s21 }
  0x41   : > { %s759_s23 = scalar_lea.vmem %s758_s21, 4096  ;;  %p760_p8 = scmp.lt.s32.totalorder %s1007_s29, %s758_s21 }
  0x42   : > { %p755_p9 = pnand %p753_p1, %p709_p3  ;;  %p761_p2 = scmp.lt.s32.totalorder %s759_s23, %s752_s11 }
  0x44   : > { %p756_p11 = pneg %p755_p9  ;;  %p762_p5 = por %p761_p2, %p760_p8 }
  0x46   : > { %p763_p4 = pnand %p762_p5, %p756_p11 }
  0x48   : > { %766 = shalt.err (!%p763_p4)
}
  0x49   : > { %s857_s8 = smov 128   ;;  %s858_s10 = smov 8  }
  0x4a   : > { %647 = dma.hbm_to_vmem [thread:$0]  (!%p960_p13), %s1005_s22, 2048, %s1007_s29, %s205_s6, %s857_s8, %s857_s8, %s858_s10  }
  0x4b   : > { %239 = sbr.rel (%p996_p6) target bundleno = 348 (0x15c), region = 32  ;;  %s1038_s30 = sand.u32 (!%p996_p6), 1, %s837_s13  }
  0x4c   : > { %s550_s4 = sshll.u32 (!%p996_p6), %s1038_s30, 3  ;;  %s242_s5 = scalar_lea.sflag (!%p996_p6), [#allocation3], %s1038_s30 }
  0x4d   : > { %s1044_s18 = scalar_lea.vmem (!%p996_p6), [#allocation2], %s550_s4  ;;  %p1148_p8 = scmp.ne.s32.totalorder (!%p996_p6), %s1141_s24, 0 }
  0x52   : > { %820 = dma.done.wait (%p1148_p8), %s242_s5, 128  }
  0x53   : > { %822 = vsyncadd (%p1148_p8), %s242_s5, 4294967168  ;;  %s551_s28 = sshll.u32 %s1038_s30, 7  ;;  %s251_s9 = scalar_lea.sflag [#allocation6], %s1038_s30 }
  0x54   : > { %s1052_s7 = scalar_lea.vmem [#allocation5], %s551_s28 }
  0x55   : > { %824 = dma.done.wait (%p1148_p8), %s251_s9, 2048  }
  0x56   : > { %826 = vsyncadd (%p1148_p8), %s251_s9, 4294965248  ;;  %v859_v0 = vmov 0.0|0.0   ;;  %vm860_vm0 = vmmov 0   ;;  %v861_v1 = vmov 0.0   ;;  %v309_v2 = vld [vmem:[%s1052_s7] sm:$0xff]  ;;  %v310_v3 = vld [vmem:[%s1052_s7 + $0x8] sm:$0xff] }
  0x57   : > { %611 = vmatprep.subr.bf16.mxu0 %v859_v0  ;;  %608 = vmatprep.mubr.msk.f32.mxu0 %vm860_vm0, %v861_v1  ;;  %v311_v4 = vld [vmem:[%s1052_s7 + $0x10] sm:$0xff]  ;;  %v612_v5 = vpack.c.bf16 %v310_v3, %v309_v2  ;;  %v312_v6 = vld [vmem:[%s1052_s7 + $0x18] sm:$0xff]  ;;  %v313_v8 = vld [vmem:[%s1052_s7 + $0x20] sm:$0xff]  ;;  %p289_p13 = scmp.lt.s32.totalorder %s845_s15, 3  ;;  %s555_s11 = sshll.u32 %s845_s15, 7 }
  0x58   : > { %v615_v7 = vpack.c.bf16 %v312_v6, %v311_v4  ;;  %v314_v9 = vld [vmem:[%s1052_s7 + $0x28] sm:$0xff]  ;;  %v315_v11 = vld [vmem:[%s1052_s7 + $0x30] sm:$0xff]  ;;  %v316_v12 = vld [vmem:[%s1052_s7 + $0x38] sm:$0xff]  ;;  %s287_s19 = scalar_lea.vmem [#allocation7], %s550_s4  ;;  %s1086_s10 = scalar_lea.hbm %s1137_s3, %s555_s11 }
  0x59   : > { %613 = vmatpush3.bf16.msra.mxu0 %v612_v5  ;;  %v618_v10 = vpack.c.bf16 %v314_v9, %v313_v8  ;;  %v621_v13 = vpack.c.bf16 %v316_v12, %v315_v11  ;;  %v317_v14 = vld [vmem:[%s1052_s7 + $0x40] sm:$0xff]  ;;  %v318_v15 = vld [vmem:[%s1052_s7 + $0x48] sm:$0xff]  ;;  %v319_v17 = vld [vmem:[%s1052_s7 + $0x50] sm:$0xff]  ;;  %s290_s24 = scalar_select %p289_p13, %s845_s15, 3 }
  0x5a   : > { %614 = vmatprep.subr.bf16.mxu0 %v859_v0  ;;  %v624_v16 = vpack.c.bf16 %v318_v15, %v317_v14  ;;  %v320_v18 = vld [vmem:[%s1052_s7 + $0x58] sm:$0xff]  ;;  %v321_v20 = vld [vmem:[%s1052_s7 + $0x60] sm:$0xff]  ;;  %v322_v21 = vld [vmem:[%s1052_s7 + $0x68] sm:$0xff]  ;;  %s413_s21 = sshll.u32 %s287_s19, 4  ;;  %s398_s5 = scalar_lea.sflag [#allocation4], %s1038_s30  ;;  %s1088_s21 = int_to_ptr.vmem [resolvable:$true] %s413_s21 }
  0x5b   : > { %v627_v19 = vpack.c.bf16 %v320_v18, %v319_v17  ;;  %v630_v22 = vpack.c.bf16 %v322_v21, %v321_v20  ;;  %v323_v23 = vld [vmem:[%s1052_s7 + $0x70] sm:$0xff]  ;;  %v324_v24 = vld [vmem:[%s1052_s7 + $0x78] sm:$0xff]  ;;  %s294_s6 = scalar_lea.vmem %s1136_s2, %s290_s24  ;;  %p1149_p6 = scmp.ne.s32.totalorder %s1142_s25, 0 }
  0x5c   : > { %v633_v25 = vpack.c.bf16 %v324_v24, %v323_v23  ;;  %v308_v26 = vld [vmem:[%s1044_s18] sm:$0xff]  ;;  %s767_s18 = scalar_lea.vmem %s1088_s21, 128  ;;  %s862_s15 = smov [#allocation7]  }
  0x5d   : > { %616 = vmatpush3.bf16.msra.mxu0 %v615_v7  ;;  %v553_v27 = vld [vmem:[%s294_s6] ss:$0 sm:$0xff]  ;;  %p768_p3 = scmp.ne.s32.totalorder %s1088_s21, %s767_s18  ;;  %s771_s4 = sshll.u32 %s862_s15, 4  ;;  %s772_s4 = int_to_ptr.vmem [resolvable:$false] %s771_s4 }
  0x5e   : > { %617 = vmatprep.subr.bf16.mxu0 %v859_v0  ;;  %s773_s28 = scalar_lea.vmem %s772_s4, 256  ;;  %p774_p10 = scmp.lt.s32.totalorder %s1088_s21, %s772_s4 }
  0x5f   : > { %p769_p12 = pnand %p768_p3, %p1149_p6  ;;  %p775_p0 = scmp.lt.s32.totalorder %s773_s28, %s767_s18 }
  0x61   : > { %619 = vmatpush3.bf16.msra.mxu0 %v618_v10  ;;  %p770_p7 = pneg %p769_p12  ;;  %p776_p1 = por %p775_p0, %p774_p10 }
  0x62   : > { %620 = vmatprep.subr.bf16.mxu0 %v859_v0 }
  0x63   : > { %p777_p9 = pnand %p776_p1, %p770_p7 }
  0x65   : > { %622 = vmatpush3.bf16.msra.mxu0 %v621_v13 }
  0x66   : > { %623 = vmatprep.subr.bf16.mxu0 %v859_v0 }
  0x69   : > { %625 = vmatpush3.bf16.msra.mxu0 %v624_v16 }
  0x6a   : > { %626 = vmatprep.subr.bf16.mxu0 %v859_v0 }
  0x6d   : > { %628 = vmatpush3.bf16.msra.mxu0 %v627_v19 }
  0x6e   : > { %629 = vmatprep.subr.bf16.mxu0 %v859_v0 }
  0x71   : > { %631 = vmatpush3.bf16.msra.mxu0 %v630_v22 }
  0x72   : > { %632 = vmatprep.subr.bf16.mxu0 %v859_v0 }
  0x75   : > { %634 = vmatpush3.bf16.msra.mxu0 %v633_v25 }
  0x78   : > { %609 = vmatmul.mubr.f32.vlgmr.msra.gmra.mrb[0].mxu0 %v308_v26 }
 0x14b   : > { %v391_v28 = vpop.f32.mrb[0].mxu0 }
 0x14c   : > { %v395_v29 = vadd.f32 %v553_v27, %v391_v28  ;;  %v610_v30 = vpop.f32.mrb[1].mxu0 }
 0x14e   : > { %396 = vst [vmem:[%s287_s19] sm:$0xff] %v395_v29 }
 0x14f   : > { %780 = shalt.err (!%p777_p9)
}
 0x150   : > { %s781_s30 = scalar_lea.hbm %s1086_s10, 128  ;;  %s785_s24 = scalar_lea.hbm %s1137_s3, 512 }
 0x151   : > { %p782_p11 = scmp.ne.s32.totalorder %s1086_s10, %s781_s30  ;;  %p786_p4 = scmp.lt.u32.totalorder %s1086_s10, %s1137_s3 }
 0x152   : > { %p787_p8 = scmp.lt.u32.totalorder %s785_s24, %s781_s30  ;;  %p789_p3 = scmp.lt.u32.totalorder %s781_s30, %s1086_s10 }
 0x153   : > { %p783_p2 = pnand %p782_p11, %p1149_p6 }
 0x154   : > { %p788_p13 = por %p787_p8, %p786_p4 }
 0x155   : > { %p784_p5 = pneg %p783_p2 }
 0x156   : > { %p790_p12 = por %p789_p3, %p788_p13 }
 0x158   : > { %p791_p7 = pnand %p790_p12, %p784_p5 }
 0x15a   : > { %794 = shalt.err (!%p791_p7)
}
 0x15b   : > { %639 = dma.vmem_to_hbm [thread:$0]  (%p1149_p6), %s1088_s21, 128, %s1086_s10, %s398_s5  }
 0x15c PF: > { %p653_p10 = scmp.ge.s32.totalorder %s853_s17, 2  ;;  %s425_s6 = sand.u32 1, %s833_s12  }
 0x15d   : > { %p1150_p0 = scmp.ne.s32.totalorder %s1143_s27, 0  ;;  %s426_s11 = scalar_lea.sflag [#allocation4], %s425_s6 }
 0x15f   : > { %p649_p1 = pnand %p653_p10, %p1150_p0 }
 0x161   : > { %828 = dma.done.wait (!%p649_p1), %s426_s11, 128  }
 0x162   : > { %830 = vsyncadd (!%p649_p1), %s426_s11, 4294967168  ;;  %s22_s17 = sadd.s32 1, %s853_s17   ;;  %s1151_s12 = smov %s837_s13 }
 0x163   : > { %p19_p9 = scmp.ge.s32.totalorder %s22_s17, 6   ;;  %s1152_s13 = smov %s841_s14 }
 0x164   : > { %s1153_s14 = smov %s939_s26  ;;  %s1154_s15 = smov %s849_s16 }
 0x165   : > { %s1155_s16 = smov %s1157_s20  ;;  %21 = sbr.rel (!%p19_p9) target bundleno = 8 (0x8), region = 97 }
 0x16c   :  { %431 = vsyncpa [#allocation3], 1 }
 0x16d   :  { %433 = vsyncpa [#allocation3 + $0x1], 1 }
 0x16e   :  { %434 = vsyncpa [#allocation6], 1 }
 0x16f   :  { %436 = vsyncpa [#allocation6 + $0x1], 1 }
 0x170   :  { %437 = vsyncpa [#allocation4], 1 }
 0x171   :  { %439 = vsyncpa [#allocation4 + $0x1], 1 }

</bundles_post_ra>
